<compile_context>
chip_gen: v7x
topology: tpu7x:2x2x1
jax: 0.10.0
libtpu: 0.0.40
codegen_flags: <defaults>
</compile_context>

<pallas_src>
import math

import jax
import jax.numpy as jnp
from jax.experimental import pallas as pl
from jax.experimental.pallas import tpu as pltpu


# ----------------------------------------------------------------------------
# Buffer setup (mirrors PositionalEncoding.__init__) -- plain JAX glue.
# ----------------------------------------------------------------------------
def make_pe_buffer(d_model: int, max_len: int = 300, dtype=jnp.float32) -> jnp.ndarray:
    """Builds the (max_len, d_model) sinusoidal PE table, exactly as in __init__.

    (torch stores it as (max_len, 1, d_model); forward indexes pe[:S, 0, :],
    so the (max_len, d_model) view is what matters.)
    """
    position = jnp.arange(0, max_len, dtype=jnp.float32)[:, None]            # (max_len, 1)
    div_term = jnp.exp(
        jnp.arange(0, d_model, 2, dtype=jnp.float32) * (-math.log(10000.0) / d_model)
    )                                                                         # (ceil(D/2),)
    angles = position * div_term                                              # (max_len, ceil(D/2))
    pe = jnp.zeros((max_len, d_model), dtype=jnp.float32)
    pe = pe.at[:, 0::2].set(jnp.sin(angles))
    if d_model % 2 == 1:
        pe = pe.at[:, 1::2].set(jnp.cos(angles)[:, : angles.shape[1] - 1])
    else:
        pe = pe.at[:, 1::2].set(jnp.cos(angles))
    return pe.astype(dtype)


def make_pe_row(pe: jnp.ndarray, seq_len: int, dtype) -> jnp.ndarray:
    """Hoisted per-(S, dtype) precompute: pe[:S, :] flattened to one (1, S*D) row."""
    d_model = pe.shape[-1]
    return pe[:seq_len, :].astype(dtype).reshape(1, seq_len * d_model)


# ----------------------------------------------------------------------------
# Pallas kernel: broadcast add over flattened rows (eval-mode dropout = identity)
# ----------------------------------------------------------------------------
def _pe_add_kernel(x_ref, pe_ref, o_ref):
    # x_ref : (tb, tl) slab of flattened (b*c) rows
    # pe_ref: (1, tl)  flattened PE lane-tile (resident across the inner row loop)
    # o_ref : (tb, tl)
    o_ref[...] = x_ref[...] + pe_ref[...]   # implicit sublane broadcast


def _choose_tiles(R: int, L: int, itemsize: int, target_bytes: int):
    """Pick (tb, tl) obeying the (8,128)/packing rules with ~target_bytes blocks."""
    # dtype-aware sublane packing: f32 -> 8, bf16/f16 -> 16, int8/fp8 -> 32
    pack = {4: 8, 2: 16, 1: 32}.get(itemsize, 8)

    # --- lane tile: multiple of 128 (or full L), bounded so a minimal
    #     (pack-row) block still fits the byte budget.
    tl_cap = max(128, ((target_bytes // (pack * itemsize)) // 128) * 128)
    if L <= tl_cap:
        tl = L
    else:
        tl = 0
        if L % 128 == 0:
            d = tl_cap
            while d >= 128:           # prefer a divisor of L -> unmasked last block
                if L % d == 0:
                    tl = d
                    break
                d -= 128
        if tl == 0:
            tl = tl_cap               # ragged last lane block (masked but correct)

    # --- row tile: multiple of pack (or full R), within the remaining budget.
    rows_budget = max(1, target_bytes // (tl * itemsize))
    if R <= rows_budget:
        tb = R
    else:
        tb = 0
        cand = (rows_budget // pack) * pack
        while cand >= pack:           # prefer a divisor of R -> unmasked last block
            if R % cand == 0:
                tb = cand
                break
            cand -= pack
        if tb == 0:
            tb = max(pack, (rows_budget // pack) * pack)   # ragged last row block

    # --- megacore (v7x has 2 TCs): make sure a big-enough problem gets >= 2
    #     grid steps so "parallel" can shard across cores.
    grid_steps = -(-R // tb) * -(-L // tl)
    if grid_steps == 1 and R * L * itemsize >= (1 << 20):
        if R % (2 * pack) == 0:
            tb = R // 2
        elif L % 256 == 0:
            tl = L // 2

    return tb, tl


# ----------------------------------------------------------------------------
# Forward wrapper
# ----------------------------------------------------------------------------
def positional_encoding_forward(
    x: jnp.ndarray, pe_row: jnp.ndarray, *, target_bytes: int = 2 << 20
) -> jnp.ndarray:
    """x: (B, C, S, D); pe_row: (1, S*D) precomputed in x.dtype.
    Returns x + pe[:S, 0, :] (dropout = identity / eval mode)."""
    B, C, S, D = x.shape
    R, L = B * C, S * D
    assert pe_row.shape == (1, L) and pe_row.dtype == x.dtype

    x_flat = x.reshape(R, L)
    tb, tl = _choose_tiles(R, L, jnp.dtype(x.dtype).itemsize, target_bytes)

    # Grid: lane-tiles outer, row-tiles inner -> the PE block index is constant
    # across the inner loop, so Pallas keeps it resident (no re-fetch).
    grid = (pl.cdiv(L, tl), pl.cdiv(R, tb))

    out_flat = pl.pallas_call(
        _pe_add_kernel,
        out_shape=jax.ShapeDtypeStruct((R, L), x.dtype),
        grid_spec=pl.GridSpec(
            grid=grid,
            in_specs=[
                pl.BlockSpec((tb, tl), lambda j, i: (i, j)),   # x slab
                pl.BlockSpec((1, tl), lambda j, i: (0, j)),    # PE lane-tile (resident)
            ],
            out_specs=pl.BlockSpec((tb, tl), lambda j, i: (i, j)),
        ),
        input_output_aliases={0: 0},    # donate x's flattened buffer to the output
        compiler_params=pltpu.CompilerParams(
            dimension_semantics=("parallel", "parallel"),
        ),
    )(x_flat, pe_row)

    return out_flat.reshape(B, C, S, D)


# ----------------------------------------------------------------------------
# Demo / correctness check
# ----------------------------------------------------------------------------
if __name__ == "__main__":
    # --- main demo: small shapes consistent with the module ---------------
    B, C, S, D = 2, 4, 16, 32          # d_model = 32, seq len = x.size(2) = 16
    MAX_LEN = 300

    key = jax.random.PRNGKey(0)
    x = jax.random.normal(key, (B, C, S, D), dtype=jnp.float32)

    pe = make_pe_buffer(D, max_len=MAX_LEN, dtype=jnp.float32)
    pe_row = make_pe_row(pe, S, x.dtype)            # hoisted out of the per-call path

    fwd = jax.jit(positional_encoding_forward)
    out = jax.block_until_ready(fwd(x, pe_row))

    # Pure-JAX reference of the torch forward (eval mode dropout == identity).
    expected = x + pe[:S, :][None, None, :, :]
    assert out.shape == x.shape and out.dtype == x.dtype
    assert jnp.allclose(out, expected, atol=1e-6, rtol=1e-6), "mismatch vs reference"

    # --- secondary check: force lane+row tiling and a ragged row grid -----
    B2, C2, S2, D2 = 2, 7, 16, 64                   # R = 14 (ragged vs tb=8), L = 1024
    x2 = jax.random.normal(jax.random.PRNGKey(1), (B2, C2, S2, D2), dtype=jnp.float32)
    pe2 = make_pe_buffer(D2, max_len=MAX_LEN, dtype=jnp.float32)
    pe2_row = make_pe_row(pe2, S2, x2.dtype)
    out2 = jax.block_until_ready(
        positional_encoding_forward(x2, pe2_row, target_bytes=4096)
    )
    exp2 = x2 + pe2[:S2, :][None, None, :, :]
    assert jnp.allclose(out2, exp2, atol=1e-6, rtol=1e-6), "tiled-path mismatch"

    print("KERNEL_OK")
</pallas_src>

<mosaic_0001>
module attributes {stable_mosaic.version = 11 : i64} {
  func.func @_pe_add_kernel(%arg0: i32, %arg1: i32, %arg2: memref<8x512xf32, #tpu.memory_space<vmem>>, %arg3: memref<1x512xf32, #tpu.memory_space<vmem>>, %arg4: memref<8x512xf32, #tpu.memory_space<vmem>>) attributes {dimension_semantics = [#tpu.dimension_semantics<parallel>, #tpu.dimension_semantics<parallel>], iteration_bounds = array<i64: 1, 1>, scalar_prefetch = 0 : i64, scratch_operands = 0 : i64, tpu.core_type = #tpu.core_type<tc>, window_params = [{transform_indices = @transform_0, window_bounds = array<i64: 8, 512>}, {transform_indices = @transform_1, window_bounds = array<i64: 1, 512>}, {transform_indices = @transform_2, window_bounds = array<i64: 8, 512>}]} {
    %c0 = arith.constant 0 : index
    %c0_0 = arith.constant 0 : index
    %0 = vector.load %arg2[%c0, %c0_0] : memref<8x512xf32, #tpu.memory_space<vmem>>, vector<8x512xf32>
    %c0_1 = arith.constant 0 : index
    %c0_2 = arith.constant 0 : index
    %1 = vector.load %arg3[%c0_1, %c0_2] : memref<1x512xf32, #tpu.memory_space<vmem>>, vector<1x512xf32>
    %2 = vector.broadcast %1 : vector<1x512xf32> to vector<8x512xf32>
    %3 = arith.addf %0, %2 : vector<8x512xf32>
    %c0_3 = arith.constant 0 : index
    %c0_4 = arith.constant 0 : index
    %4 = vector.load %arg4[%c0_3, %c0_4] : memref<8x512xf32, #tpu.memory_space<vmem>>, vector<8x512xf32>
    tpu.vector_store %arg4[%c0_3, %c0_4], %3 {strides = array<i32>} : memref<8x512xf32, #tpu.memory_space<vmem>>, vector<8x512xf32>,
    return
  }
  func.func @transform_0(%arg0: i32, %arg1: i32) -> (i32, i32) {
    %c0_i32 = arith.constant 0 : i32
    return %arg1, %arg0 : i32, i32
  }
  func.func @transform_1(%arg0: i32, %arg1: i32) -> (i32, i32) {
    %c0_i32 = arith.constant 0 : i32
    %c0_i32_0 = arith.constant 0 : i32
    return %c0_i32, %arg0 : i32, i32
  }
  func.func @transform_2(%arg0: i32, %arg1: i32) -> (i32, i32) {
    %c0_i32 = arith.constant 0 : i32
    return %arg1, %arg0 : i32, i32
  }
}

</mosaic_0001>

<bundles_post_ra>
// kernel: positional_encoding_forward.1
= control target key start
LH: loop header
LB: loop body
LE: loop exit
PB: predicated region body
PF: predicated region fallthrough
CT: control target
= control target key end

     0   :  { %v17_v0 = vlaneseq  ;;  %s91_s1 = inlined_call_operand.vmem [shape: f32[1,512], index: 1, kind: input, shape index: {}]   ;;  %s92_s0 = inlined_call_operand.vmem [shape: f32[8,512], index: 0, kind: input, shape index: {}, may-alias: {0,2}]   ;;  %s93_s2 = inlined_call_operand.vmem [shape: f32[8,512], index: 2, kind: output, shape index: {}, may-alias: {0,2}]  }
   0x1   :  { %v15_v2 = vld [vmem:[%s91_s1] sm:$0xf]  ;;  %v12_v8 = vld [vmem:[%s92_s0 + $0x8] sm:$0xff]  ;;  %v13_v9 = vld [vmem:[%s92_s0 + $0x10] sm:$0xff] }
   0x2   :  { %v18_v1 = vshrl.u32 %v17_v0, 7  ;;  %v11_v3 = vld [vmem:[%s92_s0] sm:$0xff]  ;;  %v14_v10 = vld [vmem:[%s92_s0 + $0x18] sm:$0xff] }
   0x4   :  { %v19_v4 = vsub.s32 0, %v18_v1  ;;  %v23_v5 = vsub.s32 1, %v18_v1  ;;  %v27_v6 = vsub.s32 2, %v18_v1  ;;  %v31_v7 = vsub.s32 3, %v18_v1 }
   0x6   :  { %v20_v11 = vrot.slane %v15_v2, %v19_v4  ;;  %v24_v12 = vrot.slane %v15_v2, %v23_v5  ;;  %v28_v13 = vrot.slane %v15_v2, %v27_v6  ;;  %v32_v14 = vrot.slane %v15_v2, %v31_v7 }
   0x8   :  { %v37_v15 = vadd.f32 %v20_v11, %v11_v3  ;;  %v38_v16 = vadd.f32 %v24_v12, %v12_v8  ;;  %v39_v17 = vadd.f32 %v28_v13, %v13_v9  ;;  %v40_v18 = vadd.f32 %v32_v14, %v14_v10 }
   0xa   :  { %41 = vst [vmem:[%s93_s2] sm:$0xff] %v37_v15  ;;  %42 = vst [vmem:[%s93_s2 + $0x8] sm:$0xff] %v38_v16 }
   0xb   :  { %43 = vst [vmem:[%s93_s2 + $0x10] sm:$0xff] %v39_v17  ;;  %44 = vst [vmem:[%s93_s2 + $0x18] sm:$0xff] %v40_v18 }

</bundles_post_ra>
